<compile_context>
chip_gen: v7x
topology: tpu7x:2x2x1
jax: 0.10.0
libtpu: 0.0.40
codegen_flags: <defaults>
</compile_context>

<pallas_src>
import functools

import jax
import jax.numpy as jnp
from jax.experimental import pallas as pl
from jax.experimental.pallas import tpu as pltpu


def _round_up(a, b):
    return -(-a // b) * b


def frozen_bn_kernel(x_ref, scale_ref, bias_ref, o_ref, *, tr, sub, resident):
    if resident:
        # scale/bias are grid-resident (constant index map): slice the current rows.
        r0 = pl.multiple_of(pl.program_id(0) * tr, sub)
        s = scale_ref[pl.ds(r0, tr), :]
        b = bias_ref[pl.ds(r0, tr), :]
    else:
        s = scale_ref[...]
        b = bias_ref[...]
    x = x_ref[...].astype(jnp.float32)
    o_ref[...] = (x * s + b).astype(o_ref.dtype)


def _vmem_capacity_bytes():
    try:
        info = pltpu.get_tpu_info()
        cap = getattr(info, "vmem_capacity_bytes", None)
        if cap:
            return int(cap)
    except Exception:
        pass
    return 64 * 1024 * 1024  # conservative default (v7x per-TC VMEM)


def _pick_row_tile(R, sub, tr_cap):
    """Largest multiple of `sub` <= tr_cap that divides R, but only if it is at
    least tr_cap/2; otherwise take tr_cap and let the last grid block be ragged."""
    t = max(sub, (tr_cap // sub) * sub)
    d = t
    while d >= sub:
        if R % d == 0 and d >= max(sub, t // 2):
            return d
        d -= sub
    return t


def frozen_batch_norm_2d(x, weight, bias, running_mean, running_var, *, eps=1e-5):
    """x: (N, C, H, W) in NCHW (PyTorch layout). weight/bias/running_*: shape (C,)."""
    N, C, H, W = x.shape
    R, L = N * C, H * W
    itemsize = jnp.dtype(x.dtype).itemsize

    # O(C) precompute in float32 (exactly the PyTorch forward's scale/bias).
    w32 = weight.astype(jnp.float32)
    b32 = bias.astype(jnp.float32)
    rm32 = running_mean.astype(jnp.float32)
    rv32 = running_var.astype(jnp.float32)
    scale_c = w32 * jax.lax.rsqrt(rv32 + jnp.float32(eps))
    bias_c = b32 - rm32 * scale_c

    x2 = x.reshape(R, L)

    # ---- Generation-aware tile sizing, based on LANE-PADDED bytes -------------
    sub = 16 if x.dtype == jnp.bfloat16 else 8     # min sublane tile
    L_pad = _round_up(L, 128)                      # VMEM stores 128-lane-padded rows
    row_bytes = L_pad * itemsize

    vmem_cap = _vmem_capacity_bytes()
    if vmem_cap >= (100 << 20):                    # v5e / v6e: 128 MiB physical VMEM
        target_block = 16 << 20
        vmem_budget = 96 << 20
    else:                                          # v7x: 64 MiB physical VMEM
        target_block = 8 << 20
        vmem_budget = 48 << 20

    tr_cap = max(sub, (target_block // row_bytes) // sub * sub)
    tr_cap = min(tr_cap, _round_up(R, sub))
    if R >= 2 * sub:
        # Keep >= 2 grid steps so the "parallel" axis can shard across 2 TensorCores.
        tr_cap = min(tr_cap, max(sub, _round_up(-(-R // 2), sub)))
    tr = _pick_row_tile(R, sub, tr_cap)

    num_steps = pl.cdiv(R, tr)                     # ragged last block handled by Pallas
    R_pad = num_steps * tr

    # Per-row params (row r = n*C + c -> channel c), padded to R_pad (tiny arrays)
    # so the in-kernel resident slices never go out of bounds.
    scale_r = jnp.tile(scale_c, (N,)).reshape(R, 1)
    bias_r = jnp.tile(bias_c, (N,)).reshape(R, 1)
    if R_pad != R:
        scale_r = jnp.pad(scale_r, ((0, R_pad - R), (0, 0)))
        bias_r = jnp.pad(bias_r, ((0, R_pad - R), (0, 0)))

    # Grid-resident params (constant index map -> no per-step DMA) unless the
    # lane-padded resident columns would eat too much VMEM.
    param_buf = R_pad * 128 * 4                    # lane-padded f32 column
    resident = (4 * param_buf) <= (8 << 20)
    if resident:
        param_spec = pl.BlockSpec((R_pad, 1), lambda i: (0, 0))
        param_need = 4 * param_buf                 # conservative (assume 2 buffers)
    else:
        param_spec = pl.BlockSpec((tr, 1), lambda i: (i, 0))
        param_need = 4 * (tr * 128 * 4)

    blk_x = tr * L_pad * itemsize                  # padded per-step x / out block
    need = 4 * blk_x + param_need + (4 << 20)      # 2x(x) + 2x(out) + params + headroom
    vmem_limit = int(min(vmem_budget, max(32 << 20, need)))
    if need > vmem_limit:
        # TODO(synk): split the lane axis for extremely large H*W rows.
        vmem_limit = int(need)

    kernel = functools.partial(frozen_bn_kernel, tr=tr, sub=sub, resident=resident)

    out2 = pl.pallas_call(
        kernel,
        out_shape=jax.ShapeDtypeStruct((R, L), x.dtype),
        grid=(num_steps,),
        in_specs=[
            pl.BlockSpec((tr, L), lambda i: (i, 0)),   # x rows (ragged last block OK)
            param_spec,                                # per-row scale
            param_spec,                                # per-row bias
        ],
        out_specs=pl.BlockSpec((tr, L), lambda i: (i, 0)),
        compiler_params=pltpu.CompilerParams(
            dimension_semantics=("parallel",),
            vmem_limit_bytes=vmem_limit,
        ),
        cost_estimate=pl.CostEstimate(
            flops=2 * R * L,
            transcendentals=0,
            bytes_accessed=2 * R * L * itemsize + 8 * R_pad,
        ),
    )(x2, scale_r, bias_r)

    return out2.reshape(N, C, H, W)


def _reference(x, weight, bias, running_mean, running_var, eps=1e-5):
    C = x.shape[1]
    w = weight.reshape(1, C, 1, 1).astype(jnp.float32)
    b = bias.reshape(1, C, 1, 1).astype(jnp.float32)
    rv = running_var.reshape(1, C, 1, 1).astype(jnp.float32)
    rm = running_mean.reshape(1, C, 1, 1).astype(jnp.float32)
    scale = w * jax.lax.rsqrt(rv + jnp.float32(eps))
    bb = b - rm * scale
    return (x.astype(jnp.float32) * scale + bb).astype(x.dtype)


if __name__ == "__main__":
    key = jax.random.PRNGKey(0)
    kx1, kx2, kx3, kx4, kw, kb, km, kv = jax.random.split(key, 8)

    def make_params(C):
        w = jax.random.normal(kw, (C,), dtype=jnp.float32)
        b = jax.random.normal(kb, (C,), dtype=jnp.float32)
        rm = jax.random.normal(km, (C,), dtype=jnp.float32)
        rv = jax.random.uniform(kv, (C,), dtype=jnp.float32, minval=0.5, maxval=2.0)
        return w, b, rm, rv

    cases = [
        # (shape, rng_key) — lane-dense, ragged-rows/non-128 lanes, multi-step resident,
        # and multi-step with a ragged last block.
        ((2, 4, 16, 16), kx1),
        ((2, 3, 7, 7), kx2),
        ((2, 24, 14, 14), kx3),
        ((1, 40, 8, 16), kx4),
    ]

    for shape, kx in cases:
        N, C, H, W = shape
        x = jax.random.normal(kx, shape, dtype=jnp.float32)
        w, b, rm, rv = make_params(C)
        out = frozen_batch_norm_2d(x, w, b, rm, rv)
        out = jax.block_until_ready(out)
        ref = _reference(x, w, b, rm, rv)
        assert out.shape == shape and out.dtype == x.dtype
        assert jnp.allclose(out, ref, atol=1e-5, rtol=1e-5), f"mismatch for {shape}"

    print("KERNEL_OK")
</pallas_src>

<mosaic_0001>
module attributes {stable_mosaic.version = 11 : i64} {
  func.func @frozen_bn_kernel(%arg0: i32, %arg1: memref<8x256xf32, #tpu.memory_space<vmem>>, %arg2: memref<8x1xf32, #tpu.memory_space<vmem>>, %arg3: memref<8x1xf32, #tpu.memory_space<vmem>>, %arg4: memref<8x256xf32, #tpu.memory_space<vmem>>) attributes {dimension_semantics = [#tpu.dimension_semantics<parallel>], iteration_bounds = array<i64: 1>, scalar_prefetch = 0 : i64, scratch_operands = 0 : i64, tpu.core_type = #tpu.core_type<tc>, window_params = [{transform_indices = @transform_0, window_bounds = array<i64: 8, 256>}, {pipeline_mode = #tpu.pipeline_mode<synchronous>, transform_indices = @transform_1, window_bounds = array<i64: 8, 1>}, {pipeline_mode = #tpu.pipeline_mode<synchronous>, transform_indices = @transform_2, window_bounds = array<i64: 8, 1>}, {transform_indices = @transform_3, window_bounds = array<i64: 8, 256>}]} {
    %c8_i32 = arith.constant 8 : i32
    %0 = arith.muli %arg0, %c8_i32 : i32
    %1 = tpu.assume_multiple %0, 8 : i32
    %2 = arith.index_cast %1 : i32 to index
    %c0 = arith.constant 0 : index
    %3 = vector.load %arg2[%2, %c0] : memref<8x1xf32, #tpu.memory_space<vmem>>, vector<8x1xf32>
    %4 = arith.index_cast %1 : i32 to index
    %c0_0 = arith.constant 0 : index
    %5 = vector.load %arg3[%4, %c0_0] : memref<8x1xf32, #tpu.memory_space<vmem>>, vector<8x1xf32>
    %c0_1 = arith.constant 0 : index
    %c0_2 = arith.constant 0 : index
    %6 = vector.load %arg1[%c0_1, %c0_2] : memref<8x256xf32, #tpu.memory_space<vmem>>, vector<8x256xf32>
    %7 = vector.broadcast %3 : vector<8x1xf32> to vector<8x256xf32>
    %8 = arith.mulf %6, %7 : vector<8x256xf32>
    %9 = vector.broadcast %5 : vector<8x1xf32> to vector<8x256xf32>
    %10 = arith.addf %8, %9 : vector<8x256xf32>
    %c0_3 = arith.constant 0 : index
    %c0_4 = arith.constant 0 : index
    %11 = vector.load %arg4[%c0_3, %c0_4] : memref<8x256xf32, #tpu.memory_space<vmem>>, vector<8x256xf32>
    tpu.vector_store %arg4[%c0_3, %c0_4], %10 {strides = array<i32>} : memref<8x256xf32, #tpu.memory_space<vmem>>, vector<8x256xf32>,
    return
  }
  func.func @transform_0(%arg0: i32) -> (i32, i32) {
    %c0_i32 = arith.constant 0 : i32
    %c0_i32_0 = arith.constant 0 : i32
    return %arg0, %c0_i32 : i32, i32
  }
  func.func @transform_1(%arg0: i32) -> (i32, i32) {
    %c0_i32 = arith.constant 0 : i32
    %c0_i32_0 = arith.constant 0 : i32
    %c0_i32_1 = arith.constant 0 : i32
    return %c0_i32, %c0_i32_0 : i32, i32
  }
  func.func @transform_2(%arg0: i32) -> (i32, i32) {
    %c0_i32 = arith.constant 0 : i32
    %c0_i32_0 = arith.constant 0 : i32
    %c0_i32_1 = arith.constant 0 : i32
    return %c0_i32, %c0_i32_0 : i32, i32
  }
  func.func @transform_3(%arg0: i32) -> (i32, i32) {
    %c0_i32 = arith.constant 0 : i32
    %c0_i32_0 = arith.constant 0 : i32
    return %arg0, %c0_i32 : i32, i32
  }
}

</mosaic_0001>

<bundles_post_ra>
// kernel: tpu_custom_call.1
= control target key start
LH: loop header
LB: loop body
LE: loop exit
PB: predicated region body
PF: predicated region fallthrough
CT: control target
= control target key end

     0   :  { %v79_v1 = vmov 0   ;;  %s125_s0 = inlined_call_operand.vmem [shape: f32[8,256], index: 0, kind: input, shape index: {}]   ;;  %s126_s1 = inlined_call_operand.vmem [shape: f32[8,1], index: 1, kind: input, shape index: {}]   ;;  %s127_s2 = inlined_call_operand.vmem [shape: f32[8,1], index: 2, kind: input, shape index: {}]   ;;  %s128_s3 = inlined_call_operand.hbm [shape: f32[8,256], index: 3, kind: output, shape index: {}]  }
   0x1   :  { %v17_v0 = vld [vmem:[%s126_s1] sm:$0xff]  ;;  %54 = vset.pattern.permute.xlu0 %v79_v1 }
   0x2   :  { %8 = vsyncpa [#allocation3], 0  ;;  %24 = vperm.xlu0 %54, %v17_v0   ;;  %v19_v2 = vld [vmem:[%s127_s2] sm:$0xff]  ;;  %v21_v4 = vld [vmem:[%s125_s0 + $0x8] sm:$0xff]  ;;  %s80_s20 = smov [#allocation2]  }
   0x3   :  { %v20_v3 = vld [vmem:[%s125_s0] sm:$0xff]  ;;  %s44_s1 = sshll.u32 %s80_s20, 4  ;;  %s45_s1 = int_to_ptr.vmem [resolvable:$true] %s44_s1 }
   0x4   :  { %s55_s2 = scalar_lea.vmem %s45_s1, 256  ;;  %p60_p1 = scmp.lt.s32.totalorder %s45_s1, %s45_s1 }
   0x5   :  { %p56_p0 = scmp.ne.s32.totalorder %s45_s1, %s55_s2  ;;  %p61_p2 = scmp.lt.s32.totalorder %s55_s2, %s55_s2 }
   0x6   :  { %31 = vperm.xlu0 %54, %v19_v2  }
   0x7   :  { %p62_p3 = por %p61_p2, %p60_p1 }
   0x9   :  { %p63_p4 = pnand %p62_p3, %p56_p0 }
  0x81   :  { %v25_v5 = vpop.permute.xlu0 %24 }
  0x82   :  { %v27_v6 = vmul.f32 %v25_v5, %v20_v3  ;;  %v28_v7 = vmul.f32 %v25_v5, %v21_v4 }
  0x85   :  { %v32_v8 = vpop.permute.xlu0 %31 }
  0x86   :  { %v34_v9 = vadd.f32 %v32_v8, %v27_v6  ;;  %v35_v10 = vadd.f32 %v32_v8, %v28_v7 }
  0x88   :  { %36 = vst [vmem:[#allocation2] sm:$0xff] %v34_v9  ;;  %37 = vst [vmem:[#allocation2 + $0x8] sm:$0xff] %v35_v10 }
  0x89   :  { %66 = shalt.err (!%p63_p4)
}
  0x8a   :  { %s67_s22 = scalar_lea.hbm %s128_s3, 256 }
  0x8b   :  { %p68_p5 = scmp.ne.s32.totalorder %s128_s3, %s67_s22  ;;  %p71_p6 = scmp.lt.u32.totalorder %s67_s22, %s128_s3 }
  0x8d   :  { %p73_p7 = pnand %p71_p6, %p68_p5 }
  0x8f   :  { %76 = shalt.err (!%p73_p7)
}
  0x90   :  { %47 = dma.vmem_to_hbm [thread:$0]  %s45_s1, 256, %s128_s3, [#allocation3]  }
  0x91   :  { %77 = dma.done.wait [#allocation3], 256  }
  0x92   :  { %78 = vsyncadd [#allocation3], 4294967040 }
  0x93   :  { %51 = vsyncpa [#allocation3], 1 }

</bundles_post_ra>
